<compile_context>
chip_gen: v5e
topology: v5e:2x2
jax: 0.10.0
libtpu: 0.0.40
codegen_flags: <defaults>
</compile_context>

<pallas_src>
import functools

import jax
import jax.numpy as jnp
from jax import lax
from jax.experimental import pallas as pl
from jax.experimental.pallas import tpu as pltpu

_LANE = 128
_SUB = 8
_VMEM_BUDGET = 40 * 1024 * 1024  # conservative: fits v7x 64 MiB / v6e-v5e 128 MiB


def _round_up(x, m):
    return ((x + m - 1) // m) * m


def _pad2(x, rows, cols, dtype):
    x = x.astype(dtype)
    if x.shape == (rows, cols):
        return x
    return jnp.zeros((rows, cols), dtype).at[:x.shape[0], :x.shape[1]].set(x)


def _resident_spec(shape):
    """Constant-index (VMEM-resident) BlockSpec, single-buffered when supported."""
    nd = len(shape)
    index_map = lambda i, _nd=nd: (0,) * _nd
    try:
        return pl.BlockSpec(shape, index_map, pipeline_mode=pl.Buffered(1))
    except (TypeError, AttributeError):  # older BlockSpec signature fallback
        return pl.BlockSpec(shape, index_map)


# -----------------------------------------------------------------------------
# Pallas kernel bodies.
# -----------------------------------------------------------------------------
def _attention_core(feats, wq, kt, v, num_centers):
    # q = features @ (Wq * scale)  (bf16 MXU operands, f32 accumulate)
    q = jnp.dot(feats.astype(wq.dtype), wq,
                preferred_element_type=jnp.float32)                  # [tb, Ap] f32
    # scores = q @ kT  (kT pre-transposed in the wrapper -> no in-kernel transpose)
    scores = jnp.dot(q.astype(kt.dtype), kt,
                     preferred_element_type=jnp.float32)             # [tb, Cp] f32
    # Mask padded (zero) center columns out of the softmax.
    if num_centers < scores.shape[-1]:
        col = lax.broadcasted_iota(jnp.int32, scores.shape, 1)
        scores = jnp.where(col < num_centers, scores, -1e30)
    # f32 softmax with EUP approx reciprocal.
    scores = scores - jnp.max(scores, axis=-1, keepdims=True)
    p = jnp.exp(scores)
    p = p * pl.reciprocal(jnp.sum(p, axis=-1, keepdims=True), approx=True)
    return jnp.dot(p.astype(v.dtype), v,
                   preferred_element_type=jnp.float32)               # [tb, Ap] f32


def _fused_kernel_proj(feat_ref, wq_ref, kt_ref, v_ref, wp_ref, bp_ref, out_ref,
                       *, num_centers):
    feats = feat_ref[...]
    attn = _attention_core(feats, wq_ref[...], kt_ref[...], v_ref[...],
                           num_centers)
    proj = jnp.dot(attn.astype(wp_ref.dtype), wp_ref[...],
                   preferred_element_type=jnp.float32) + bp_ref[...]
    fp = feats.shape[1]
    out_ref[:, :fp] = feats.astype(out_ref.dtype)     # features || proj, fused
    out_ref[:, fp:] = proj.astype(out_ref.dtype)


def _fused_kernel_identity(feat_ref, wq_ref, kt_ref, v_ref, out_ref, *,
                           num_centers):
    # feature_dim == attention_dim: nn.Identity projection -> no matmul, no bias.
    feats = feat_ref[...]
    attn = _attention_core(feats, wq_ref[...], kt_ref[...], v_ref[...],
                           num_centers)
    fp = feats.shape[1]
    out_ref[:, :fp] = feats.astype(out_ref.dtype)
    out_ref[:, fp:] = attn.astype(out_ref.dtype)


# -----------------------------------------------------------------------------
# Wrapper: K/V hoist, padding, VMEM-aware batch tiling, pallas_call.
# -----------------------------------------------------------------------------
def centroid_attention_kernel_call(features, centers, wq, wk, wv, wp=None,
                                   bp=None, *, scale, block_b=None,
                                   compute_dtype=jnp.bfloat16):
    B, F = features.shape
    C = centers.shape[0]
    A = wq.shape[1]
    use_proj = wp is not None
    Fo = wp.shape[1] if use_proj else A
    out_dtype = features.dtype

    # Lane-pad every matmul dim to 128 (centers axis included, per perf review).
    Fp = _round_up(F, _LANE)
    Ap = _round_up(A, _LANE)
    Cp = _round_up(C, _LANE)
    Fop = _round_up(Fo, _LANE)

    # ---- Hoist K/V: computed once in plain XLA, passed as small residents. ----
    k = jnp.dot(centers, wk)                               # [C, A]
    v = jnp.dot(centers, wv)                               # [C, A]
    kt_p = _pad2(k.T, Ap, Cp, compute_dtype)               # [Ap, Cp] bf16 resident
    v_p = _pad2(v, Cp, Ap, compute_dtype)                  # [Cp, Ap] bf16 resident
    wq_p = _pad2(wq * scale, Fp, Ap, compute_dtype)        # scale folded once

    feat_bytes = jnp.dtype(out_dtype).itemsize
    out_bytes = feat_bytes
    cbytes = jnp.dtype(compute_dtype).itemsize

    resident_bytes = (Fp * Ap + Ap * Cp + Cp * Ap) * cbytes
    if use_proj:
        resident_bytes += Ap * Fop * cbytes + Fop * 4
    resident_alloc = 2 * resident_bytes   # conservative even with Buffered(1)

    # ---- VMEM-aware batch-tile sizing. ----
    inter_row = (2 * Ap + Cp + (Fop if use_proj else 0)) * 4   # q/attn/p/proj f32
    per_row = (Fp * feat_bytes * 2                              # streamed input x2
               + (Fp + Fop) * out_bytes * 2                     # streamed output x2
               + inter_row)
    if block_b is None:
        budget = max(_VMEM_BUDGET - resident_alloc - (2 << 20), per_row * _SUB)
        tb = budget // per_row
        if tb >= 256:
            tb = (tb // 256) * 256        # MXU-height tiles on v6e/v7x
        elif tb >= 128:
            tb = 128
        else:
            tb = max(_SUB, (tb // _SUB) * _SUB)
        tb = min(tb, 1024)
    else:
        tb = max(_SUB, _round_up(block_b, _SUB))
    tb = min(tb, _round_up(B, _SUB))
    Bp = _round_up(B, tb)

    # Skip the feature pad copy entirely when already aligned (no HBM round-trip).
    if Bp == B and Fp == F:
        feats_p = features
    else:
        feats_p = jnp.zeros((Bp, Fp), out_dtype).at[:B, :F].set(features)

    args = [feats_p, wq_p, kt_p, v_p]
    in_specs = [
        pl.BlockSpec((tb, Fp), lambda i: (i, 0)),   # streamed per batch tile
        _resident_spec((Fp, Ap)),                   # Wq * scale (bf16)
        _resident_spec((Ap, Cp)),                   # kT (bf16)
        _resident_spec((Cp, Ap)),                   # v (bf16)
    ]
    if use_proj:
        wp_p = _pad2(wp, Ap, Fop, compute_dtype)
        bp_p = _pad2(bp.astype(jnp.float32), 1, Fop, jnp.float32)
        args += [wp_p, bp_p]
        in_specs += [_resident_spec((Ap, Fop)), _resident_spec((1, Fop))]
        kernel = functools.partial(_fused_kernel_proj, num_centers=C)
    else:
        kernel = functools.partial(_fused_kernel_identity, num_centers=C)

    # Explicit VMEM limit (raises v5e's 16 MiB default; safe on v7x's 64 MiB).
    vmem_needed = (resident_alloc
                   + tb * Fp * feat_bytes * 2
                   + tb * (Fp + Fop) * out_bytes * 2
                   + tb * inter_row)
    vmem_limit = int(min(max(vmem_needed + (4 << 20), 32 << 20), 48 << 20))

    # CostEstimate matches the hoisted kernel (K/V no longer computed per step).
    flops = 2 * Bp * (Fp * Ap + Ap * Cp + Cp * Ap
                      + (Ap * Fop if use_proj else 0))
    bytes_accessed = (Bp * Fp * feat_bytes + resident_bytes
                      + Bp * (Fp + Fop) * out_bytes)
    cost = pl.CostEstimate(flops=int(flops), transcendentals=int(Bp * Cp),
                           bytes_accessed=int(bytes_accessed))

    fused = pl.pallas_call(
        kernel,
        out_shape=jax.ShapeDtypeStruct((Bp, Fp + Fop), out_dtype),
        grid=(Bp // tb,),
        in_specs=in_specs,
        out_specs=pl.BlockSpec((tb, Fp + Fop), lambda i: (i, 0)),
        compiler_params=pltpu.CompilerParams(
            dimension_semantics=("parallel",),
            vmem_limit_bytes=vmem_limit),
        cost_estimate=cost,
    )(*args)

    # Fast path: no padding anywhere -> fused block IS features || attention.
    if Bp == B and Fp == F and Fop == Fo:
        return fused
    return jnp.concatenate([features, fused[:B, Fp:Fp + Fo]], axis=-1)


# -----------------------------------------------------------------------------
# Plain-JAX glue: functional version of update_center (register_buffer state).
# -----------------------------------------------------------------------------
def update_center(features, labels, centers, center_values, center_counts,
                  num_classes):
    # TODO(synk): torch mutates registered buffers in-place under no_grad; here
    # the updated buffers are returned functionally.
    if labels is None:
        return centers, jnp.zeros_like(center_values), jnp.zeros_like(center_counts)
    onehot = jax.nn.one_hot(labels, num_classes, dtype=features.dtype)   # [B, C]
    class_sums = onehot.T @ features                                     # [C, F]
    class_counts = jnp.sum(onehot, axis=0, keepdims=True).T              # [C, 1]
    new_values = center_values + class_sums
    new_counts = center_counts + class_counts
    present = class_counts > 0
    safe_counts = jnp.where(new_counts > 0, new_counts, 1.0)
    new_centers = jnp.where(present, new_values / safe_counts, centers)
    return new_centers, new_values, new_counts


# -----------------------------------------------------------------------------
# Module-equivalent wrapper.
# -----------------------------------------------------------------------------
def init_params(key, num_classes, feature_dim, attention_dim, dtype=jnp.float32):
    kq, kk, kv, kp, kb = jax.random.split(key, 5)
    s = 0.05
    params = {
        # stored pre-transposed [in, out]: y = x @ W  (== torch x @ W.T)
        "wq": s * jax.random.normal(kq, (feature_dim, attention_dim), dtype),
        "wk": s * jax.random.normal(kk, (feature_dim, attention_dim), dtype),
        "wv": s * jax.random.normal(kv, (feature_dim, attention_dim), dtype),
    }
    if feature_dim != attention_dim:
        params["wp"] = s * jax.random.normal(kp, (attention_dim, feature_dim), dtype)
        params["bp"] = s * jax.random.normal(kb, (1, feature_dim), dtype)
    buffers = {
        "centers": jnp.zeros((num_classes, feature_dim), dtype),
        "center_values": jnp.zeros((num_classes, feature_dim), dtype),
        "center_counts": jnp.zeros((num_classes, 1), dtype),
    }
    return params, buffers


def centroid_attention_forward(params, buffers, features, labels, *,
                               num_classes, attention_dim):
    scale = attention_dim ** (-0.5)
    centers, new_vals, new_counts = update_center(
        features, labels, buffers["centers"], buffers["center_values"],
        buffers["center_counts"], num_classes)
    out = centroid_attention_kernel_call(
        features, centers, params["wq"], params["wk"], params["wv"],
        params.get("wp"), params.get("bp"), scale=scale)
    new_buffers = {"centers": centers, "center_values": new_vals,
                   "center_counts": new_counts}
    return out, new_buffers


# -----------------------------------------------------------------------------
# Reference (pure JAX, f32) for a sanity check.
# -----------------------------------------------------------------------------
def reference_forward(params, centers, features, scale):
    q = features @ params["wq"]
    k = centers @ params["wk"]
    v = centers @ params["wv"]
    scores = jax.nn.softmax((q @ k.T) * scale, axis=-1)
    attn = scores @ v
    if "wp" in params:
        attn = attn @ params["wp"] + params["bp"]
    return jnp.concatenate([features, attn], axis=-1)


if __name__ == "__main__":
    key = jax.random.PRNGKey(0)

    configs = [
        # (num_classes, feature_dim, attention_dim, batch)
        (8, 32, 16, 8),       # learned projection + padded dims (fallback path)
        (6, 32, 32, 8),       # identity projection + padded-class masking
        (128, 128, 128, 16),  # identity, fully lane-aligned -> fused fast path
        (4, 128, 256, 16),    # projection + class masking, fused fast path
    ]
    for cfg_i, (num_classes, feature_dim, attention_dim, batch) in enumerate(configs):
        kparam, kfeat, klab, key = jax.random.split(key, 4)
        params, buffers = init_params(kparam, num_classes, feature_dim,
                                      attention_dim)
        features = jax.random.normal(kfeat, (batch, feature_dim), jnp.float32)
        labels = jax.random.randint(klab, (batch,), 0, num_classes)

        out, new_buffers = centroid_attention_forward(
            params, buffers, features, labels,
            num_classes=num_classes, attention_dim=attention_dim)
        out = jax.block_until_ready(out)

        ref = reference_forward(params, new_buffers["centers"], features,
                                attention_dim ** (-0.5))
        exp_cols = feature_dim + (feature_dim if "wp" in params else attention_dim)
        assert out.shape == (batch, exp_cols), (cfg_i, out.shape)
        # bf16 MXU operands + EUP approx reciprocal -> modest tolerance
        assert jnp.allclose(out, ref, atol=2e-2, rtol=2e-2), (
            cfg_i, float(jnp.max(jnp.abs(out - ref))))

    print("KERNEL_OK")
</pallas_src>

<mosaic_0001>
module attributes {stable_mosaic.version = 11 : i64} {
  func.func @_fused_kernel_proj(%arg0: i32, %arg1: memref<8x128xf32, #tpu.memory_space<vmem>>, %arg2: memref<128x128xbf16, #tpu.memory_space<vmem>>, %arg3: memref<128x128xbf16, #tpu.memory_space<vmem>>, %arg4: memref<128x128xbf16, #tpu.memory_space<vmem>>, %arg5: memref<128x128xbf16, #tpu.memory_space<vmem>>, %arg6: memref<1x128xf32, #tpu.memory_space<vmem>>, %arg7: memref<8x256xf32, #tpu.memory_space<vmem>>) attributes {dimension_semantics = [#tpu.dimension_semantics<parallel>], iteration_bounds = array<i64: 1>, scalar_prefetch = 0 : i64, scratch_operands = 0 : i64, tpu.core_type = #tpu.core_type<tc>, window_params = [{transform_indices = @transform_0, window_bounds = array<i64: 8, 128>}, {pipeline_mode = #tpu.pipeline_mode<synchronous>, transform_indices = @transform_1, window_bounds = array<i64: 128, 128>}, {pipeline_mode = #tpu.pipeline_mode<synchronous>, transform_indices = @transform_2, window_bounds = array<i64: 128, 128>}, {pipeline_mode = #tpu.pipeline_mode<synchronous>, transform_indices = @transform_3, window_bounds = array<i64: 128, 128>}, {pipeline_mode = #tpu.pipeline_mode<synchronous>, transform_indices = @transform_4, window_bounds = array<i64: 128, 128>}, {pipeline_mode = #tpu.pipeline_mode<synchronous>, transform_indices = @transform_5, window_bounds = array<i64: 1, 128>}, {transform_indices = @transform_6, window_bounds = array<i64: 8, 256>}]} {
    %c0 = arith.constant 0 : index
    %c0_0 = arith.constant 0 : index
    %0 = vector.load %arg1[%c0, %c0_0] : memref<8x128xf32, #tpu.memory_space<vmem>>, vector<8x128xf32>
    %c0_1 = arith.constant 0 : index
    %c0_2 = arith.constant 0 : index
    %1 = vector.load %arg2[%c0_1, %c0_2] : memref<128x128xbf16, #tpu.memory_space<vmem>>, vector<128x128xbf16>
    %c0_3 = arith.constant 0 : index
    %c0_4 = arith.constant 0 : index
    %2 = vector.load %arg3[%c0_3, %c0_4] : memref<128x128xbf16, #tpu.memory_space<vmem>>, vector<128x128xbf16>
    %c0_5 = arith.constant 0 : index
    %c0_6 = arith.constant 0 : index
    %3 = vector.load %arg4[%c0_5, %c0_6] : memref<128x128xbf16, #tpu.memory_space<vmem>>, vector<128x128xbf16>
    %4 = arith.truncf %0 : vector<8x128xf32> to vector<8x128xbf16>
    %cst = arith.constant dense<0.000000e+00> : vector<8x128xf32>
    %5 = tpu.matmul %4, %1, %cst {dimension_numbers = #tpu.dot_dimension_numbers<[1], [0], [0], [1], [0, 0, 1, 1], [], []>} : vector<8x128xbf16>, vector<128x128xbf16>, vector<8x128xf32> -> vector<8x128xf32>
    %6 = arith.truncf %5 : vector<8x128xf32> to vector<8x128xbf16>
    %cst_7 = arith.constant dense<0.000000e+00> : vector<8x128xf32>
    %7 = tpu.matmul %6, %2, %cst_7 {dimension_numbers = #tpu.dot_dimension_numbers<[1], [0], [0], [1], [0, 0, 1, 1], [], []>} : vector<8x128xbf16>, vector<128x128xbf16>, vector<8x128xf32> -> vector<8x128xf32>
    %8 = tpu.iota {dimensions = array<i32: 1>} : vector<8x128xi32>
    %c8_i32 = arith.constant 8 : i32
    %9 = vector.broadcast %c8_i32 : i32 to vector<8x128xi32>
    %10 = arith.cmpi slt, %8, %9 : vector<8x128xi32>
    %cst_8 = arith.constant -1.000000e+30 : f32
    %11 = vector.broadcast %cst_8 : f32 to vector<8x128xf32>
    %12 = arith.select %10, %7, %11 : vector<8x128xi1>, vector<8x128xf32>
    %cst_9 = arith.constant dense<0xFF800000> : vector<8xf32>
    %13 = vector.multi_reduction <maximumf>, %12, %cst_9 [1] : vector<8x128xf32> to vector<8xf32>
    %14 = vector.shape_cast %13 : vector<8xf32> to vector<8x1xf32>
    %15 = vector.broadcast %14 : vector<8x1xf32> to vector<8x128xf32>
    %16 = arith.subf %12, %15 : vector<8x128xf32>
    %17 = math.exp %16 : vector<8x128xf32>
    %cst_10 = arith.constant dense<0.000000e+00> : vector<8xf32>
    %18 = vector.multi_reduction <add>, %17, %cst_10 [1] : vector<8x128xf32> to vector<8xf32>
    %19 = vector.shape_cast %18 : vector<8xf32> to vector<8x1xf32>
    %20 = tpu.reciprocal %19 {approx = true} : vector<8x1xf32> -> vector<8x1xf32>
    %21 = vector.broadcast %20 : vector<8x1xf32> to vector<8x128xf32>
    %22 = arith.mulf %17, %21 : vector<8x128xf32>
    %23 = arith.truncf %22 : vector<8x128xf32> to vector<8x128xbf16>
    %cst_11 = arith.constant dense<0.000000e+00> : vector<8x128xf32>
    %24 = tpu.matmul %23, %3, %cst_11 {dimension_numbers = #tpu.dot_dimension_numbers<[1], [0], [0], [1], [0, 0, 1, 1], [], []>} : vector<8x128xbf16>, vector<128x128xbf16>, vector<8x128xf32> -> vector<8x128xf32>
    %25 = arith.truncf %24 : vector<8x128xf32> to vector<8x128xbf16>
    %c0_12 = arith.constant 0 : index
    %c0_13 = arith.constant 0 : index
    %26 = vector.load %arg5[%c0_12, %c0_13] : memref<128x128xbf16, #tpu.memory_space<vmem>>, vector<128x128xbf16>
    %cst_14 = arith.constant dense<0.000000e+00> : vector<8x128xf32>
    %27 = tpu.matmul %25, %26, %cst_14 {dimension_numbers = #tpu.dot_dimension_numbers<[1], [0], [0], [1], [0, 0, 1, 1], [], []>} : vector<8x128xbf16>, vector<128x128xbf16>, vector<8x128xf32> -> vector<8x128xf32>
    %c0_15 = arith.constant 0 : index
    %c0_16 = arith.constant 0 : index
    %28 = vector.load %arg6[%c0_15, %c0_16] : memref<1x128xf32, #tpu.memory_space<vmem>>, vector<1x128xf32>
    %29 = vector.broadcast %28 : vector<1x128xf32> to vector<8x128xf32>
    %30 = arith.addf %27, %29 : vector<8x128xf32>
    %c0_17 = arith.constant 0 : index
    %c0_18 = arith.constant 0 : index
    %31 = vector.load %arg7[%c0_17, %c0_18] : memref<8x256xf32, #tpu.memory_space<vmem>>, vector<8x128xf32>
    tpu.vector_store %arg7[%c0_17, %c0_18], %0 {strides = array<i32>} : memref<8x256xf32, #tpu.memory_space<vmem>>, vector<8x128xf32>,
    %c0_19 = arith.constant 0 : index
    %c128 = arith.constant 128 : index
    %32 = vector.load %arg7[%c0_19, %c128] : memref<8x256xf32, #tpu.memory_space<vmem>>, vector<8x128xf32>
    tpu.vector_store %arg7[%c0_19, %c128], %30 {strides = array<i32>} : memref<8x256xf32, #tpu.memory_space<vmem>>, vector<8x128xf32>,
    return
  }
  func.func @transform_0(%arg0: i32) -> (i32, i32) {
    %c0_i32 = arith.constant 0 : i32
    %c0_i32_0 = arith.constant 0 : i32
    return %arg0, %c0_i32 : i32, i32
  }
  func.func @transform_1(%arg0: i32) -> (i32, i32) {
    %c0_i32 = arith.constant 0 : i32
    %c0_i32_0 = arith.constant 0 : i32
    %c0_i32_1 = arith.constant 0 : i32
    return %c0_i32, %c0_i32_0 : i32, i32
  }
  func.func @transform_2(%arg0: i32) -> (i32, i32) {
    %c0_i32 = arith.constant 0 : i32
    %c0_i32_0 = arith.constant 0 : i32
    %c0_i32_1 = arith.constant 0 : i32
    return %c0_i32, %c0_i32_0 : i32, i32
  }
  func.func @transform_3(%arg0: i32) -> (i32, i32) {
    %c0_i32 = arith.constant 0 : i32
    %c0_i32_0 = arith.constant 0 : i32
    %c0_i32_1 = arith.constant 0 : i32
    return %c0_i32, %c0_i32_0 : i32, i32
  }
  func.func @transform_4(%arg0: i32) -> (i32, i32) {
    %c0_i32 = arith.constant 0 : i32
    %c0_i32_0 = arith.constant 0 : i32
    %c0_i32_1 = arith.constant 0 : i32
    return %c0_i32, %c0_i32_0 : i32, i32
  }
  func.func @transform_5(%arg0: i32) -> (i32, i32) {
    %c0_i32 = arith.constant 0 : i32
    %c0_i32_0 = arith.constant 0 : i32
    %c0_i32_1 = arith.constant 0 : i32
    return %c0_i32, %c0_i32_0 : i32, i32
  }
  func.func @transform_6(%arg0: i32) -> (i32, i32) {
    %c0_i32 = arith.constant 0 : i32
    %c0_i32_0 = arith.constant 0 : i32
    return %arg0, %c0_i32 : i32, i32
  }
}

</mosaic_0001>

<bundles_post_ra>
// kernel: tpu_custom_call.1
= control target key start
LH: loop header
LB: loop body
LE: loop exit
PB: predicated region body
PF: predicated region fallthrough
CT: control target
= control target key end

     0   :  { %11 = vsyncpa [#allocation3], 0  ;;  %s840_s0 = inlined_call_operand.hbm [shape: f32[8,128], index: 0, kind: input, shape index: {}]   ;;  %s841_s1 = inlined_call_operand.hbm [shape: bf16[128,128], index: 1, kind: input, shape index: {}]   ;;  %s842_s2 = inlined_call_operand.hbm [shape: bf16[128,128], index: 2, kind: input, shape index: {}]   ;;  %s843_s3 = inlined_call_operand.hbm [shape: bf16[128,128], index: 3, kind: input, shape index: {}]   ;;  %s844_s4 = inlined_call_operand.hbm [shape: bf16[128,128], index: 4, kind: input, shape index: {}]   ;;  %s845_s5 = inlined_call_operand.vmem [shape: f32[1,128], index: 5, kind: input, shape index: {}]   ;;  %s846_s6 = inlined_call_operand.hbm [shape: f32[8,256], index: 6, kind: output, shape index: {}]  }
   0x1   :  { %12 = vsyncpa [#allocation6], 0 }
   0x2   :  { %13 = vsyncpa [#allocation9], 0  ;;  %s30_s23 = sshll.u32 %s841_s1, 4  ;;  %s31_s23 = int_to_ptr.hbm [resolvable:$true] %s30_s23 }
   0x3   :  { %14 = vsyncpa [#allocation4], 0  ;;  %s776_s24 = smov [#allocation5]   ;;  %s56_s28 = sshll.u32 %s843_s3, 4  ;;  %s57_s28 = int_to_ptr.hbm [resolvable:$true] %s56_s28 }
   0x4   :  { %s32_s25 = sshll.u32 %s776_s24, 4  ;;  %s777_s29 = smov 64   ;;  %s33_s25 = int_to_ptr.vmem [resolvable:$true] %s32_s25 }
   0x5   :  { %s778_s30 = smov 4   ;;  %s779_s7 = smov [#allocation8]  }
   0x6   :  { %38 = dma.hbm_to_vmem [thread:$0]  %s31_s23, 1024, %s33_s25, [#allocation6], %s777_s29, %s777_s29, %s778_s30  }
   0x7   :  { %s58_s8 = sshll.u32 %s779_s7, 4  ;;  %s20_s11 = sshll.u32 %s840_s0, 4  ;;  %s59_s8 = int_to_ptr.vmem [resolvable:$true] %s58_s8  ;;  %s21_s11 = int_to_ptr.hbm [resolvable:$true] %s20_s11 }
   0x8   :  { %64 = dma.hbm_to_vmem [thread:$0]  %s57_s28, 1024, %s59_s8, [#allocation9], %s777_s29, %s777_s29, %s778_s30  }
   0x9   :  { %s43_s13 = sshll.u32 %s842_s2, 4  ;;  %s780_s14 = smov [#allocation2]   ;;  %s44_s13 = int_to_ptr.hbm [resolvable:$true] %s43_s13 }
   0xa   :  { %s22_s15 = sshll.u32 %s780_s14, 4  ;;  %s781_s3 = smov [#allocation7]   ;;  %s23_s15 = int_to_ptr.vmem [resolvable:$true] %s22_s15 }
   0xb   :  { %25 = dma.hbm_to_vmem [thread:$0]  %s21_s11, 128, %s23_s15, [#allocation3]  }
   0xc   :  { %s45_s16 = sshll.u32 %s781_s3, 4  ;;  %s69_s19 = sshll.u32 %s844_s4, 4  ;;  %s46_s16 = int_to_ptr.vmem [resolvable:$true] %s45_s16  ;;  %s70_s19 = int_to_ptr.hbm [resolvable:$true] %s69_s19 }
   0xd   :  { %51 = dma.hbm_to_vmem [thread:$0]  %s44_s13, 1024, %s46_s16, [#allocation6], %s777_s29, %s777_s29, %s778_s30  }
   0xe   :  { %s782_s0 = smov [#allocation10]  }
   0xf   :  { %s71_s20 = sshll.u32 %s782_s0, 4  ;;  %s72_s20 = int_to_ptr.vmem [resolvable:$true] %s71_s20 }
  0x10   :  { %77 = dma.hbm_to_vmem [thread:$0]  %s70_s19, 1024, %s72_s20, [#allocation9], %s777_s29, %s777_s29, %s778_s30  }
  0x11   :  { %768 = dma.done.wait [#allocation3], 128  }
  0x12   :  { %769 = vsyncadd [#allocation3], 4294967168 }
  0x13   :  { %770 = dma.done.wait [#allocation6], 2048  }
  0x14   :  { %771 = vsyncadd [#allocation6], 4294965248 }
  0x15   :  { %772 = dma.done.wait [#allocation9], 2048  }
  0x16   :  { %773 = vsyncadd [#allocation9], 4294965248  ;;  %v586_v0 = vld [vmem:[#allocation5 + $0x38] sm:$0xff]  ;;  %v585_v1 = vld [vmem:[#allocation5 + $0x30] sm:$0xff]  ;;  %v273_v21 = vlaneseq  ;;  %s783_s21 = smov [#allocation11]   ;;  %s439_s25 = sshll.u32 %s846_s6, 4  ;;  %s440_s25 = int_to_ptr.hbm [resolvable:$true] %s439_s25 }
  0x17   :  { %198 = vmatpush.bf16.msra.mxu0 %v586_v0  ;;  %v100_v2 = vld [vmem:[#allocation2] sm:$0xff]  ;;  %v593_v4 = vld [vmem:[#allocation7 + $0x30] sm:$0xff]  ;;  %v584_v5 = vld [vmem:[#allocation5 + $0x28] sm:$0xff]  ;;  %s437_s22 = sshll.u32 %s783_s21, 4  ;;  %s438_s22 = int_to_ptr.vmem [resolvable:$true] %s437_s22 }
  0x18   :  { %430 = vst [vmem:[#allocation11] sm:$0xff] %v100_v2  ;;  %v594_v3 = vld [vmem:[#allocation7 + $0x38] sm:$0xff]  ;;  %v592_v6 = vld [vmem:[#allocation7 + $0x28] sm:$0xff]  ;;  %v583_v7 = vld [vmem:[#allocation5 + $0x20] sm:$0xff]  ;;  %v149_v16 = vpack.c.bf16 %v100_v2, %v100_v2  ;;  %v274_v22 = vand.u32 127, %v273_v21 }
  0x19   :  { %260 = vmatpush.bf16.msra.mxu1 %v594_v3  ;;  %v591_v8 = vld [vmem:[#allocation7 + $0x20] sm:$0xff]  ;;  %v582_v9 = vld [vmem:[#allocation5 + $0x18] sm:$0xff]  ;;  %v581_v11 = vld [vmem:[#allocation5 + $0x10] sm:$0xff] }
  0x1a   :  { %v590_v10 = vld [vmem:[#allocation7 + $0x18] sm:$0xff]  ;;  %v589_v12 = vld [vmem:[#allocation7 + $0x10] sm:$0xff]  ;;  %v580_v13 = vld [vmem:[#allocation5 + $0x8] sm:$0xff]  ;;  %vm275_vm0 = vcmp.lt.s32.totalorder %v274_v22, 8 }
  0x1b   :  { %199 = vmatpush.bf16.msra.mxu0 %v585_v1  ;;  %v588_v14 = vld [vmem:[#allocation7 + $0x8] sm:$0xff]  ;;  %v579_v15 = vld [vmem:[#allocation5] sm:$0xff]  ;;  %v602_v26 = vld [vmem:[#allocation8 + $0x38] sm:$0xff] }
  0x1c   :  { %v587_v17 = vld [vmem:[#allocation7] sm:$0xff]  ;;  %335 = vmatpush.bf16.msra.mxu2 %v602_v26  ;;  %v601_v27 = vld [vmem:[#allocation8 + $0x30] sm:$0xff]  ;;  %v600_v28 = vld [vmem:[#allocation8 + $0x28] sm:$0xff] }
  0x1d   :  { %261 = vmatpush.bf16.msra.mxu1 %v593_v4  ;;  %v599_v29 = vld [vmem:[#allocation8 + $0x20] sm:$0xff]  ;;  %v598_v30 = vld [vmem:[#allocation8 + $0x18] sm:$0xff]  ;;  %v597_v35 = vld [vmem:[#allocation8 + $0x10] sm:$0xff] }
  0x1e   :  { %v596_v36 = vld [vmem:[#allocation8 + $0x8] sm:$0xff]  ;;  %v595_v37 = vld [vmem:[#allocation8] sm:$0xff]  ;;  %v610_v38 = vld [vmem:[#allocation10 + $0x38] sm:$0xff] }
  0x1f   :  { %200 = vmatpush.bf16.msra.mxu0 %v584_v5  ;;  %417 = vmatpush.bf16.msra.mxu3 %v610_v38  ;;  %v609_v39 = vld [vmem:[#allocation10 + $0x30] sm:$0xff]  ;;  %v608_v40 = vld [vmem:[#allocation10 + $0x28] sm:$0xff]  ;;  %v607_v41 = vld [vmem:[#allocation10 + $0x20] sm:$0xff] }
  0x20   :  { %336 = vmatpush.bf16.msra.mxu2 %v601_v27  ;;  %v606_v42 = vld [vmem:[#allocation10 + $0x18] sm:$0xff]  ;;  %v605_v43 = vld [vmem:[#allocation10 + $0x10] sm:$0xff]  ;;  %v604_v45 = vld [vmem:[#allocation10 + $0x8] sm:$0xff] }
  0x21   :  { %262 = vmatpush.bf16.msra.mxu1 %v592_v6  ;;  %v603_v49 = vld [vmem:[#allocation10] sm:$0xff]  ;;  %v619_v53 = vld [vmem:[%s845_s5] ss:$0 sm:$0xff] }
  0x23   :  { %201 = vmatpush.bf16.msra.mxu0 %v583_v7  ;;  %418 = vmatpush.bf16.msra.mxu3 %v609_v39 }
  0x24   :  { %337 = vmatpush.bf16.msra.mxu2 %v600_v28 }
  0x25   :  { %263 = vmatpush.bf16.msra.mxu1 %v591_v8 }
  0x27   :  { %202 = vmatpush.bf16.msra.mxu0 %v582_v9  ;;  %419 = vmatpush.bf16.msra.mxu3 %v608_v40 }
  0x28   :  { %338 = vmatpush.bf16.msra.mxu2 %v599_v29 }
  0x29   :  { %264 = vmatpush.bf16.msra.mxu1 %v590_v10 }
  0x2b   :  { %203 = vmatpush.bf16.msra.mxu0 %v581_v11  ;;  %420 = vmatpush.bf16.msra.mxu3 %v607_v41 }
  0x2c   :  { %339 = vmatpush.bf16.msra.mxu2 %v598_v30 }
  0x2d   :  { %265 = vmatpush.bf16.msra.mxu1 %v589_v12 }
  0x2f   :  { %204 = vmatpush.bf16.msra.mxu0 %v580_v13  ;;  %421 = vmatpush.bf16.msra.mxu3 %v606_v42 }
  0x30   :  { %340 = vmatpush.bf16.msra.mxu2 %v597_v35 }
  0x31   :  { %266 = vmatpush.bf16.msra.mxu1 %v588_v14 }
  0x33   :  { %205 = vmatpush.bf16.msra.mxu0 %v579_v15  ;;  %422 = vmatpush.bf16.msra.mxu3 %v605_v43 }
  0x34   :  { %341 = vmatpush.bf16.msra.mxu2 %v596_v36 }
  0x35   :  { %267 = vmatpush.bf16.msra.mxu1 %v587_v17 }
  0x36   :  { %206 = vmatmul.bf16.vlgmr.msra.gmra.mxu0 %v149_v16 }
  0x37   :  { %423 = vmatpush.bf16.msra.mxu3 %v604_v45 }
  0x38   :  { %342 = vmatpush.bf16.msra.mxu2 %v595_v37 }
  0x3b   :  { %424 = vmatpush.bf16.msra.mxu3 %v603_v49 }
  0xb3   :  { %v207_v18 = vpop.f32.mrf.mxu0 }
  0xb4   :  { %v211_v19 = vpack.c.bf16 %v207_v18, %v207_v18 }
  0xb6   :  { %268 = vmatmul.bf16.vlgmr.msra.gmra.mxu1 %v211_v19 }
  0xbb   :  { %v209_v20 = vpop.f32.mrf.mxu0 }
 0x133   :  { %v269_v23 = vpop.f32.mrf.mxu1 }
 0x134   :  { %v276_v24 = vsel %vm275_vm0, %v269_v23, -1e+30 }
 0x135   :  { %277 = vmax.xlane.f32.xlu0 %v276_v24 }
 0x13b   :  { %v271_v25 = vpop.f32.mrf.mxu1 }
 0x1a8   :  { %v278_v31 = vpop.xlane.xlu0 %277 }
 0x1a9   :  { %v279_v32 = vsub.f32 %v276_v24, %v278_v31 }
 0x1ab   :  { %v280_v33 = vmul.f32 1.442695, %v279_v32 }
 0x1ad   :  { %620 = vpow2.f32 %v280_v33 }
 0x1b3   :  { %v621_v34 = vpop.eup %620 }
 0x1b4   :  { %282 = vadd.xlane.f32.xlu0 %v621_v34 }
 0x227   :  { %v283_v44 = vpop.xlane.xlu0 %282 }
 0x228   :  { %622 = vrcp.f32 %v283_v44 }
 0x22e   :  { %v623_v46 = vpop.eup %622 }
 0x22f   :  { %v285_v47 = vmul.f32 %v623_v46, %v621_v34 }
 0x231   :  { %v286_v48 = vpack.c.bf16 %v285_v47, %v285_v47 }
 0x233   :  { %343 = vmatmul.bf16.vlgmr.msra.gmra.mxu2 %v286_v48 }
 0x2b6   :  { %v344_v50 = vpop.f32.mrf.mxu2 }
 0x2b7   :  { %v348_v51 = vpack.c.bf16 %v344_v50, %v344_v50 }
 0x2b9   :  { %425 = vmatmul.bf16.vlgmr.msra.gmra.mxu3 %v348_v51 }
 0x2be   :  { %v346_v52 = vpop.f32.mrf.mxu2 }
 0x33c   :  { %v426_v54 = vpop.f32.mrf.mxu3 }
 0x33d   :  { %v427_v55 = vadd.f32 %v619_v53, %v426_v54 }
 0x33f   :  { %431 = vst [vmem:[#allocation11 + $0x8] sm:$0xff] %v427_v55 }
 0x340   :  { %442 = dma.vmem_to_hbm [thread:$0]  %s438_s22, 256, %s440_s25, [#allocation4]  }
 0x344   :  { %v428_v56 = vpop.f32.mrf.mxu3 }
 0x345   :  { %774 = dma.done.wait [#allocation4], 256  }
 0x346   :  { %775 = vsyncadd [#allocation4], 4294967040 }
 0x347   :  { %447 = vsyncpa [#allocation3], 1 }
 0x348   :  { %448 = vsyncpa [#allocation6], 1 }
 0x349   :  { %449 = vsyncpa [#allocation9], 1 }
 0x34a   :  { %450 = vsyncpa [#allocation4], 1 }

</bundles_post_ra>
